<compile_context>
chip_gen: v7x
topology: tpu7x:2x2x1
jax: 0.10.0
libtpu: 0.0.40
codegen_flags: <defaults>
</compile_context>

<pallas_src>
import functools
from types import SimpleNamespace

import jax
import jax.numpy as jnp
from jax import lax
from jax.experimental import pallas as pl
from jax.experimental.pallas import tpu as pltpu


def _round_up(v, m):
    return (v + m - 1) // m * m


def _pad_to(arr, shape):
    return jnp.pad(arr, [(0, t - s) for s, t in zip(arr.shape, shape)])


# -----------------------------------------------------------------------------
# Kernel 1: one GCN layer    out = act((A @ X) @ W + b)
#   grid = (row tiles of A [parallel], contraction tiles over N [arbitrary])
#   bf16 MXU operands, f32 VMEM accumulator, f32 epilogue.
# -----------------------------------------------------------------------------
def _gcn_layer_kernel(a_ref, x_ref, w_ref, b_ref, o_ref, acc_ref, *, relu):
    k = pl.program_id(1)

    @pl.when(k == 0)
    def _():
        acc_ref[...] = jnp.zeros_like(acc_ref)

    # (TM, TK) x (TK, Din) on the MXU, accumulated in f32.
    acc_ref[...] += jnp.dot(a_ref[...], x_ref[...],
                            preferred_element_type=jnp.float32)

    @pl.when(k == pl.num_programs(1) - 1)
    def _():
        h = jnp.dot(acc_ref[...].astype(jnp.bfloat16), w_ref[...],
                    preferred_element_type=jnp.float32) + b_ref[...]
        if relu:
            h = jnp.maximum(h, 0.0)
        o_ref[...] = h.astype(o_ref.dtype)


def _gcn_layer(a, x, w, b, *, relu, out_dtype, tm, tk):
    n = a.shape[0]
    din = x.shape[1]
    dout = w.shape[1]
    flops = 2 * n * n * din + 2 * n * din * dout
    bytes_acc = (n * n + n * din + din * dout) * 2 + n * dout * jnp.dtype(out_dtype).itemsize
    return pl.pallas_call(
        functools.partial(_gcn_layer_kernel, relu=relu),
        out_shape=jax.ShapeDtypeStruct((n, dout), out_dtype),
        grid_spec=pltpu.PrefetchScalarGridSpec(
            num_scalar_prefetch=0,
            grid=(n // tm, n // tk),
            in_specs=[
                pl.BlockSpec((tm, tk), lambda i, k: (i, k)),      # A row/col tile
                pl.BlockSpec((tk, din), lambda i, k: (k, 0)),     # X contraction tile
                pl.BlockSpec((din, dout), lambda i, k: (0, 0)),   # W (resident)
                pl.BlockSpec((1, dout), lambda i, k: (0, 0)),     # b (resident)
            ],
            out_specs=pl.BlockSpec((tm, dout), lambda i, k: (i, 0)),
            scratch_shapes=[pltpu.VMEM((tm, din), jnp.float32)],
        ),
        compiler_params=pltpu.CompilerParams(
            dimension_semantics=("parallel", "arbitrary"),
            vmem_limit_bytes=32 * 1024 * 1024,
        ),
        cost_estimate=pl.CostEstimate(flops=int(flops), transcendentals=0,
                                      bytes_accessed=int(bytes_acc)),
    )(a, x, w, b)


# -----------------------------------------------------------------------------
# Kernel 2: structure decoder   sigmoid(Z @ Z^T), (i, j) output tiles, both
# parallel.  dot_general contracts axis 1 of both operands -> no ne.T relayout.
# -----------------------------------------------------------------------------
def _structure_kernel(zi_ref, zj_ref, o_ref):
    s = lax.dot_general(zi_ref[...], zj_ref[...],
                        dimension_numbers=(((1,), (1,)), ((), ())),
                        preferred_element_type=jnp.float32)
    o_ref[...] = jax.nn.sigmoid(s).astype(o_ref.dtype)


def _structure_decoder(z, *, tm):
    n, d = z.shape
    return pl.pallas_call(
        _structure_kernel,
        out_shape=jax.ShapeDtypeStruct((n, n), jnp.float32),
        grid_spec=pltpu.PrefetchScalarGridSpec(
            num_scalar_prefetch=0,
            grid=(n // tm, n // tm),
            in_specs=[
                pl.BlockSpec((tm, d), lambda i, j: (i, 0)),
                pl.BlockSpec((tm, d), lambda i, j: (j, 0)),
            ],
            out_specs=pl.BlockSpec((tm, tm), lambda i, j: (i, j)),
        ),
        compiler_params=pltpu.CompilerParams(
            dimension_semantics=("parallel", "parallel"),
            vmem_limit_bytes=32 * 1024 * 1024,
        ),
        cost_estimate=pl.CostEstimate(flops=int(2 * n * n * d),
                                      transcendentals=int(n * n),
                                      bytes_accessed=int(2 * n * d * 2 + n * n * 4)),
    )(z, z)


# -----------------------------------------------------------------------------
# Adjacency: O(N*K) scatter instead of one_hot densification.
# -----------------------------------------------------------------------------
def _build_normalized_adjacency(neighbor_id, n):
    rows = jnp.broadcast_to(
        jnp.arange(n, dtype=neighbor_id.dtype)[:, None], neighbor_id.shape)
    adj = jnp.zeros((n, n), jnp.float32)
    # Duplicate (row, col) pairs are harmless under max; out-of-range ids drop.
    # TODO(synk): confirm the padding-sentinel convention of neighbor_id (-1 vs N)
    # before relying on the drop behaviour for ragged neighbor lists.
    adj = adj.at[rows.reshape(-1), neighbor_id.reshape(-1)].max(1.0)
    adj = jnp.maximum(adj, jnp.eye(n, dtype=jnp.float32))        # self loops
    return adj / adj.sum(axis=1, keepdims=True)                  # D^-1 (A + I)


# -----------------------------------------------------------------------------
# JAX wrapper: adjacency build, 128-lane padding, four pipelined pallas_calls.
# -----------------------------------------------------------------------------
@jax.jit
def disen_dominant_forward(x, neighbor_id, params):
    n, f = x.shape
    hidden = params["w1"].shape[1]
    final_dim = params["w2"].shape[1]

    a = _build_normalized_adjacency(neighbor_id, n)

    # Lane/sublane padding: 128-lane feature dims, tile-aligned rows.
    # (On v6e with big graphs, bump tm to 512; v7x prefers 256.)
    tm = 256 if n >= 256 else 128
    npad = _round_up(n, tm)
    fpad = _round_up(f, 128)
    hpad = _round_up(hidden, 128)
    dpad = _round_up(final_dim, 128)

    a_p = _pad_to(a, (npad, npad)).astype(jnp.bfloat16)
    x_p = _pad_to(x.astype(jnp.float32), (npad, fpad)).astype(jnp.bfloat16)
    w1 = _pad_to(params["w1"], (fpad, hpad)).astype(jnp.bfloat16)
    b1 = _pad_to(params["b1"], (1, hpad)).astype(jnp.float32)
    w2 = _pad_to(params["w2"], (hpad, dpad)).astype(jnp.bfloat16)
    b2 = _pad_to(params["b2"], (1, dpad)).astype(jnp.float32)
    wa = _pad_to(params["wa"], (dpad, fpad)).astype(jnp.bfloat16)
    ba = _pad_to(params["ba"], (1, fpad)).astype(jnp.float32)

    # Encoder layer 1 / 2 (ReLU), attribute decoder head (linear).
    h1 = _gcn_layer(a_p, x_p, w1, b1, relu=True, out_dtype=jnp.bfloat16, tm=tm, tk=tm)
    ne = _gcn_layer(a_p, h1, w2, b2, relu=True, out_dtype=jnp.bfloat16, tm=tm, tk=tm)
    attr = _gcn_layer(a_p, ne, wa, ba, relu=False, out_dtype=jnp.float32, tm=tm, tk=tm)

    # Structure decoder sigmoid(Z Z^T).
    adj_rec = _structure_decoder(ne, tm=tm)

    # TODO(synk): for many tiny graphs, batch them block-diagonally (or add a
    # leading batch grid axis) instead of one pallas_call chain per graph.
    return attr[:n, :f].astype(x.dtype), adj_rec[:n, :n].astype(x.dtype)


# -----------------------------------------------------------------------------
# Pure-JAX f32 reference (same math, no padding / bf16) for a sanity check.
# -----------------------------------------------------------------------------
def _reference_forward(x, neighbor_id, params):
    a = _build_normalized_adjacency(neighbor_id, x.shape[0])
    h = jnp.maximum((a @ x) @ params["w1"] + params["b1"], 0.0)
    ne = jnp.maximum((a @ h) @ params["w2"] + params["b2"], 0.0)
    attr = (a @ ne) @ params["wa"] + params["ba"]
    adj = jax.nn.sigmoid(ne @ ne.T)
    return attr, adj


# -----------------------------------------------------------------------------
# Deterministic parameter initialization (glorot-uniform-like).
# -----------------------------------------------------------------------------
def init_params(key, feature_dim, config):
    if config.deck != 0:
        final_channel = max(config.channel - (config.n_layer - 1) * config.deck, 1)
    else:
        final_channel = config.channel
    final_dim = final_channel * config.kdim
    hidden_dim = config.channel * config.kdim

    def glorot(k, shape):
        fan_in, fan_out = shape
        lim = jnp.sqrt(6.0 / (fan_in + fan_out))
        return jax.random.uniform(k, shape, jnp.float32, -lim, lim)

    k1, k2, k3 = jax.random.split(key, 3)
    params = {
        "w1": glorot(k1, (feature_dim, hidden_dim)),
        "b1": jnp.zeros((1, hidden_dim), jnp.float32),
        "w2": glorot(k2, (hidden_dim, final_dim)),
        "b2": jnp.zeros((1, final_dim), jnp.float32),
        "wa": glorot(k3, (final_dim, feature_dim)),
        "ba": jnp.zeros((1, feature_dim), jnp.float32),
    }
    return params, final_channel, final_dim


# -----------------------------------------------------------------------------
if __name__ == "__main__":
    config = SimpleNamespace(channel=4, kdim=8, n_layer=2, deck=1, view_attn=False)
    N, F, K = 16, 32, 8        # nodes, feature_dim, neighbors per node

    key = jax.random.PRNGKey(0)
    kx, kn, kp = jax.random.split(key, 3)

    x = jax.random.normal(kx, (N, F), dtype=jnp.float32)
    neighbor_id = jax.random.randint(kn, (N, K), 0, N, dtype=jnp.int32)
    params, final_channel, final_dim = init_params(kp, F, config)

    decode_attribute, decode_adj = disen_dominant_forward(x, neighbor_id, params)
    decode_attribute = jax.block_until_ready(decode_attribute)
    decode_adj = jax.block_until_ready(decode_adj)

    assert decode_attribute.shape == (N, F)
    assert decode_adj.shape == (N, N)
    assert bool(jnp.all(jnp.isfinite(decode_attribute)))
    assert bool(jnp.all(jnp.isfinite(decode_adj)))
    assert bool(jnp.all((decode_adj >= 0.0) & (decode_adj <= 1.0)))

    ref_attr, ref_adj = _reference_forward(x, neighbor_id, params)
    assert bool(jnp.allclose(decode_attribute, ref_attr, atol=5e-2, rtol=5e-2))
    assert bool(jnp.allclose(decode_adj, ref_adj, atol=5e-2, rtol=5e-2))

    print("KERNEL_OK")
</pallas_src>

<mosaic_0001>
module attributes {stable_mosaic.version = 11 : i64} {
  func.func private @main(%arg0: i32) attributes {dimension_semantics = [#tpu.dimension_semantics<core_parallel>], iteration_bounds = array<i64: 2>, tpu.core_type = #tpu.core_type<sc_scalar_subcore>, window_params = []} {
    return
  }
}

module attributes {stable_mosaic.version = 11 : i64} {
  func.func private @main(%arg0: i32) attributes {dimension_semantics = [#tpu.dimension_semantics<core_parallel>], iteration_bounds = array<i64: 2>, tpu.core_type = #tpu.core_type<sc_scalar_subcore>, window_params = []} {
    return
  }
}

module attributes {stable_mosaic.version = 11 : i64} {
  func.func @_gcn_layer_kernel(%arg0: i32, %arg1: i32, %arg2: memref<128x128xbf16, #tpu.memory_space<vmem>>, %arg3: memref<128x128xbf16, #tpu.memory_space<vmem>>, %arg4: memref<128x128xbf16, #tpu.memory_space<vmem>>, %arg5: memref<1x128xf32, #tpu.memory_space<vmem>>, %arg6: memref<128x128xf32, #tpu.memory_space<vmem>>, %arg7: memref<128x128xf32, #tpu.memory_space<vmem>>) attributes {dimension_semantics = [#tpu.dimension_semantics<parallel>, #tpu.dimension_semantics<arbitrary>], iteration_bounds = array<i64: 1, 1>, scalar_prefetch = 0 : i64, scratch_operands = 1 : i64, tpu.core_type = #tpu.core_type<tc>, window_params = [{transform_indices = @transform_0, window_bounds = array<i64: 128, 128>}, {transform_indices = @transform_1, window_bounds = array<i64: 128, 128>}, {pipeline_mode = #tpu.pipeline_mode<synchronous>, transform_indices = @transform_2, window_bounds = array<i64: 128, 128>}, {pipeline_mode = #tpu.pipeline_mode<synchronous>, transform_indices = @transform_3, window_bounds = array<i64: 1, 128>}, {transform_indices = @transform_4, window_bounds = array<i64: 128, 128>}]} {
    %c0_i32 = arith.constant 0 : i32
    %0 = arith.cmpi eq, %arg1, %c0_i32 : i32
    %1 = arith.extui %0 : i1 to i32
    %c0_i32_0 = arith.constant 0 : i32
    %2 = arith.cmpi ne, %1, %c0_i32_0 : i32
    scf.if %2 {
      %cst_10 = arith.constant 0.000000e+00 : f32
      %12 = vector.broadcast %cst_10 : f32 to vector<128x128xf32>
      %c0_11 = arith.constant 0 : index
      %c0_12 = arith.constant 0 : index
      %13 = vector.load %arg7[%c0_11, %c0_12] : memref<128x128xf32, #tpu.memory_space<vmem>>, vector<128x128xf32>
      tpu.vector_store %arg7[%c0_11, %c0_12], %12 {strides = array<i32>} : memref<128x128xf32, #tpu.memory_space<vmem>>, vector<128x128xf32>,
    } else {
    }
    %c0 = arith.constant 0 : index
    %c0_1 = arith.constant 0 : index
    %3 = vector.load %arg7[%c0, %c0_1] : memref<128x128xf32, #tpu.memory_space<vmem>>, vector<128x128xf32>
    %c0_2 = arith.constant 0 : index
    %c0_3 = arith.constant 0 : index
    %4 = vector.load %arg2[%c0_2, %c0_3] : memref<128x128xbf16, #tpu.memory_space<vmem>>, vector<128x128xbf16>
    %c0_4 = arith.constant 0 : index
    %c0_5 = arith.constant 0 : index
    %5 = vector.load %arg3[%c0_4, %c0_5] : memref<128x128xbf16, #tpu.memory_space<vmem>>, vector<128x128xbf16>
    %cst = arith.constant dense<0.000000e+00> : vector<128x128xf32>
    %6 = tpu.matmul %4, %5, %cst {dimension_numbers = #tpu.dot_dimension_numbers<[1], [0], [0], [1], [0, 0, 1, 1], [], []>} : vector<128x128xbf16>, vector<128x128xbf16>, vector<128x128xf32> -> vector<128x128xf32>
    %7 = arith.addf %3, %6 : vector<128x128xf32>
    %c0_6 = arith.constant 0 : index
    %c0_7 = arith.constant 0 : index
    %8 = vector.load %arg7[%c0_6, %c0_7] : memref<128x128xf32, #tpu.memory_space<vmem>>, vector<128x128xf32>
    tpu.vector_store %arg7[%c0_6, %c0_7], %7 {strides = array<i32>} : memref<128x128xf32, #tpu.memory_space<vmem>>, vector<128x128xf32>,
    %c0_i32_8 = arith.constant 0 : i32
    %9 = arith.cmpi eq, %arg1, %c0_i32_8 : i32
    %10 = arith.extui %9 : i1 to i32
    %c0_i32_9 = arith.constant 0 : i32
    %11 = arith.cmpi ne, %10, %c0_i32_9 : i32
    scf.if %11 {
      %c0_10 = arith.constant 0 : index
      %c0_11 = arith.constant 0 : index
      %12 = vector.load %arg7[%c0_10, %c0_11] : memref<128x128xf32, #tpu.memory_space<vmem>>, vector<128x128xf32>
      %13 = arith.truncf %12 : vector<128x128xf32> to vector<128x128xbf16>
      %c0_12 = arith.constant 0 : index
      %c0_13 = arith.constant 0 : index
      %14 = vector.load %arg4[%c0_12, %c0_13] : memref<128x128xbf16, #tpu.memory_space<vmem>>, vector<128x128xbf16>
      %cst_14 = arith.constant dense<0.000000e+00> : vector<128x128xf32>
      %15 = tpu.matmul %13, %14, %cst_14 {dimension_numbers = #tpu.dot_dimension_numbers<[1], [0], [0], [1], [0, 0, 1, 1], [], []>} : vector<128x128xbf16>, vector<128x128xbf16>, vector<128x128xf32> -> vector<128x128xf32>
      %c0_15 = arith.constant 0 : index
      %c0_16 = arith.constant 0 : index
      %16 = vector.load %arg5[%c0_15, %c0_16] : memref<1x128xf32, #tpu.memory_space<vmem>>, vector<1x128xf32>
      %17 = vector.broadcast %16 : vector<1x128xf32> to vector<128x128xf32>
      %18 = arith.addf %15, %17 : vector<128x128xf32>
      %c0_17 = arith.constant 0 : index
      %c0_18 = arith.constant 0 : index
      %19 = vector.load %arg6[%c0_17, %c0_18] : memref<128x128xf32, #tpu.memory_space<vmem>>, vector<128x128xf32>
      tpu.vector_store %arg6[%c0_17, %c0_18], %18 {strides = array<i32>} : memref<128x128xf32, #tpu.memory_space<vmem>>, vector<128x128xf32>,
    } else {
    }
    return
  }
  func.func @transform_0(%arg0: i32, %arg1: i32) -> (i32, i32) {
    %c0_i32 = arith.constant 0 : i32
    return %arg0, %arg1 : i32, i32
  }
  func.func @transform_1(%arg0: i32, %arg1: i32) -> (i32, i32) {
    %c0_i32 = arith.constant 0 : i32
    %c0_i32_0 = arith.constant 0 : i32
    return %arg1, %c0_i32 : i32, i32
  }
  func.func @transform_2(%arg0: i32, %arg1: i32) -> (i32, i32) {
    %c0_i32 = arith.constant 0 : i32
    %c0_i32_0 = arith.constant 0 : i32
    %c0_i32_1 = arith.constant 0 : i32
    return %c0_i32, %c0_i32_0 : i32, i32
  }
  func.func @transform_3(%arg0: i32, %arg1: i32) -> (i32, i32) {
    %c0_i32 = arith.constant 0 : i32
    %c0_i32_0 = arith.constant 0 : i32
    %c0_i32_1 = arith.constant 0 : i32
    return %c0_i32, %c0_i32_0 : i32, i32
  }
  func.func @transform_4(%arg0: i32, %arg1: i32) -> (i32, i32) {
    %c0_i32 = arith.constant 0 : i32
    %c0_i32_0 = arith.constant 0 : i32
    return %arg0, %c0_i32 : i32, i32
  }
}

module attributes {stable_mosaic.version = 11 : i64} {
  func.func @_structure_kernel(%arg0: i32, %arg1: i32, %arg2: memref<128x128xbf16, #tpu.memory_space<vmem>>, %arg3: memref<128x128xbf16, #tpu.memory_space<vmem>>, %arg4: memref<128x128xf32, #tpu.memory_space<vmem>>) attributes {dimension_semantics = [#tpu.dimension_semantics<parallel>, #tpu.dimension_semantics<parallel>], iteration_bounds = array<i64: 1, 1>, scalar_prefetch = 0 : i64, scratch_operands = 0 : i64, tpu.core_type = #tpu.core_type<tc>, window_params = [{transform_indices = @transform_0, window_bounds = array<i64: 128, 128>}, {transform_indices = @transform_1, window_bounds = array<i64: 128, 128>}, {transform_indices = @transform_2, window_bounds = array<i64: 128, 128>}]} {
    %c0 = arith.constant 0 : index
    %c0_0 = arith.constant 0 : index
    %0 = vector.load %arg2[%c0, %c0_0] : memref<128x128xbf16, #tpu.memory_space<vmem>>, vector<128x128xbf16>
    %c0_1 = arith.constant 0 : index
    %c0_2 = arith.constant 0 : index
    %1 = vector.load %arg3[%c0_1, %c0_2] : memref<128x128xbf16, #tpu.memory_space<vmem>>, vector<128x128xbf16>
    %cst = arith.constant dense<0.000000e+00> : vector<128x128xf32>
    %2 = tpu.matmul %0, %1, %cst {dimension_numbers = #tpu.dot_dimension_numbers<[1], [1], [0], [0], [0, 0, 1, 0], [], []>} : vector<128x128xbf16>, vector<128x128xbf16>, vector<128x128xf32> -> vector<128x128xf32>
    %3 = arith.negf %2 : vector<128x128xf32>
    %4 = math.exp %3 : vector<128x128xf32>
    %cst_3 = arith.constant 1.000000e+00 : f32
    %5 = vector.broadcast %cst_3 : f32 to vector<128x128xf32>
    %6 = arith.addf %5, %4 : vector<128x128xf32>
    %7 = arith.divf %5, %6 : vector<128x128xf32>
    %c0_4 = arith.constant 0 : index
    %c0_5 = arith.constant 0 : index
    %8 = vector.load %arg4[%c0_4, %c0_5] : memref<128x128xf32, #tpu.memory_space<vmem>>, vector<128x128xf32>
    tpu.vector_store %arg4[%c0_4, %c0_5], %7 {strides = array<i32>} : memref<128x128xf32, #tpu.memory_space<vmem>>, vector<128x128xf32>,
    return
  }
  func.func @transform_0(%arg0: i32, %arg1: i32) -> (i32, i32) {
    %c0_i32 = arith.constant 0 : i32
    %c0_i32_0 = arith.constant 0 : i32
    return %arg0, %c0_i32 : i32, i32
  }
  func.func @transform_1(%arg0: i32, %arg1: i32) -> (i32, i32) {
    %c0_i32 = arith.constant 0 : i32
    %c0_i32_0 = arith.constant 0 : i32
    return %arg1, %c0_i32 : i32, i32
  }
  func.func @transform_2(%arg0: i32, %arg1: i32) -> (i32, i32) {
    %c0_i32 = arith.constant 0 : i32
    return %arg0, %arg1 : i32, i32
  }
}

module attributes {stable_mosaic.version = 11 : i64} {
  func.func @_gcn_layer_kernel(%arg0: i32, %arg1: i32, %arg2: memref<128x128xbf16, #tpu.memory_space<vmem>>, %arg3: memref<128x128xbf16, #tpu.memory_space<vmem>>, %arg4: memref<128x128xbf16, #tpu.memory_space<vmem>>, %arg5: memref<1x128xf32, #tpu.memory_space<vmem>>, %arg6: memref<128x128xbf16, #tpu.memory_space<vmem>>, %arg7: memref<128x128xf32, #tpu.memory_space<vmem>>) attributes {dimension_semantics = [#tpu.dimension_semantics<parallel>, #tpu.dimension_semantics<arbitrary>], iteration_bounds = array<i64: 1, 1>, scalar_prefetch = 0 : i64, scratch_operands = 1 : i64, tpu.core_type = #tpu.core_type<tc>, window_params = [{transform_indices = @transform_0, window_bounds = array<i64: 128, 128>}, {transform_indices = @transform_1, window_bounds = array<i64: 128, 128>}, {pipeline_mode = #tpu.pipeline_mode<synchronous>, transform_indices = @transform_2, window_bounds = array<i64: 128, 128>}, {pipeline_mode = #tpu.pipeline_mode<synchronous>, transform_indices = @transform_3, window_bounds = array<i64: 1, 128>}, {transform_indices = @transform_4, window_bounds = array<i64: 128, 128>}]} {
    %c0_i32 = arith.constant 0 : i32
    %0 = arith.cmpi eq, %arg1, %c0_i32 : i32
    %1 = arith.extui %0 : i1 to i32
    %c0_i32_0 = arith.constant 0 : i32
    %2 = arith.cmpi ne, %1, %c0_i32_0 : i32
    scf.if %2 {
      %cst_10 = arith.constant 0.000000e+00 : f32
      %12 = vector.broadcast %cst_10 : f32 to vector<128x128xf32>
      %c0_11 = arith.constant 0 : index
      %c0_12 = arith.constant 0 : index
      %13 = vector.load %arg7[%c0_11, %c0_12] : memref<128x128xf32, #tpu.memory_space<vmem>>, vector<128x128xf32>
      tpu.vector_store %arg7[%c0_11, %c0_12], %12 {strides = array<i32>} : memref<128x128xf32, #tpu.memory_space<vmem>>, vector<128x128xf32>,
    } else {
    }
    %c0 = arith.constant 0 : index
    %c0_1 = arith.constant 0 : index
    %3 = vector.load %arg7[%c0, %c0_1] : memref<128x128xf32, #tpu.memory_space<vmem>>, vector<128x128xf32>
    %c0_2 = arith.constant 0 : index
    %c0_3 = arith.constant 0 : index
    %4 = vector.load %arg2[%c0_2, %c0_3] : memref<128x128xbf16, #tpu.memory_space<vmem>>, vector<128x128xbf16>
    %c0_4 = arith.constant 0 : index
    %c0_5 = arith.constant 0 : index
    %5 = vector.load %arg3[%c0_4, %c0_5] : memref<128x128xbf16, #tpu.memory_space<vmem>>, vector<128x128xbf16>
    %cst = arith.constant dense<0.000000e+00> : vector<128x128xf32>
    %6 = tpu.matmul %4, %5, %cst {dimension_numbers = #tpu.dot_dimension_numbers<[1], [0], [0], [1], [0, 0, 1, 1], [], []>} : vector<128x128xbf16>, vector<128x128xbf16>, vector<128x128xf32> -> vector<128x128xf32>
    %7 = arith.addf %3, %6 : vector<128x128xf32>
    %c0_6 = arith.constant 0 : index
    %c0_7 = arith.constant 0 : index
    %8 = vector.load %arg7[%c0_6, %c0_7] : memref<128x128xf32, #tpu.memory_space<vmem>>, vector<128x128xf32>
    tpu.vector_store %arg7[%c0_6, %c0_7], %7 {strides = array<i32>} : memref<128x128xf32, #tpu.memory_space<vmem>>, vector<128x128xf32>,
    %c0_i32_8 = arith.constant 0 : i32
    %9 = arith.cmpi eq, %arg1, %c0_i32_8 : i32
    %10 = arith.extui %9 : i1 to i32
    %c0_i32_9 = arith.constant 0 : i32
    %11 = arith.cmpi ne, %10, %c0_i32_9 : i32
    scf.if %11 {
      %c0_10 = arith.constant 0 : index
      %c0_11 = arith.constant 0 : index
      %12 = vector.load %arg7[%c0_10, %c0_11] : memref<128x128xf32, #tpu.memory_space<vmem>>, vector<128x128xf32>
      %13 = arith.truncf %12 : vector<128x128xf32> to vector<128x128xbf16>
      %c0_12 = arith.constant 0 : index
      %c0_13 = arith.constant 0 : index
      %14 = vector.load %arg4[%c0_12, %c0_13] : memref<128x128xbf16, #tpu.memory_space<vmem>>, vector<128x128xbf16>
      %cst_14 = arith.constant dense<0.000000e+00> : vector<128x128xf32>
      %15 = tpu.matmul %13, %14, %cst_14 {dimension_numbers = #tpu.dot_dimension_numbers<[1], [0], [0], [1], [0, 0, 1, 1], [], []>} : vector<128x128xbf16>, vector<128x128xbf16>, vector<128x128xf32> -> vector<128x128xf32>
      %c0_15 = arith.constant 0 : index
      %c0_16 = arith.constant 0 : index
      %16 = vector.load %arg5[%c0_15, %c0_16] : memref<1x128xf32, #tpu.memory_space<vmem>>, vector<1x128xf32>
      %17 = vector.broadcast %16 : vector<1x128xf32> to vector<128x128xf32>
      %18 = arith.addf %15, %17 : vector<128x128xf32>
      %cst_17 = arith.constant 0.000000e+00 : f32
      %19 = vector.broadcast %cst_17 : f32 to vector<128x128xf32>
      %20 = arith.maximumf %18, %19 : vector<128x128xf32>
      %21 = arith.truncf %20 : vector<128x128xf32> to vector<128x128xbf16>
      %c0_18 = arith.constant 0 : index
      %c0_19 = arith.constant 0 : index
      %22 = vector.load %arg6[%c0_18, %c0_19] : memref<128x128xbf16, #tpu.memory_space<vmem>>, vector<128x128xbf16>
      tpu.vector_store %arg6[%c0_18, %c0_19], %21 {strides = array<i32>} : memref<128x128xbf16, #tpu.memory_space<vmem>>, vector<128x128xbf16>,
    } else {
    }
    return
  }
  func.func @transform_0(%arg0: i32, %arg1: i32) -> (i32, i32) {
    %c0_i32 = arith.constant 0 : i32
    return %arg0, %arg1 : i32, i32
  }
  func.func @transform_1(%arg0: i32, %arg1: i32) -> (i32, i32) {
    %c0_i32 = arith.constant 0 : i32
    %c0_i32_0 = arith.constant 0 : i32
    return %arg1, %c0_i32 : i32, i32
  }
  func.func @transform_2(%arg0: i32, %arg1: i32) -> (i32, i32) {
    %c0_i32 = arith.constant 0 : i32
    %c0_i32_0 = arith.constant 0 : i32
    %c0_i32_1 = arith.constant 0 : i32
    return %c0_i32, %c0_i32_0 : i32, i32
  }
  func.func @transform_3(%arg0: i32, %arg1: i32) -> (i32, i32) {
    %c0_i32 = arith.constant 0 : i32
    %c0_i32_0 = arith.constant 0 : i32
    %c0_i32_1 = arith.constant 0 : i32
    return %c0_i32, %c0_i32_0 : i32, i32
  }
  func.func @transform_4(%arg0: i32, %arg1: i32) -> (i32, i32) {
    %c0_i32 = arith.constant 0 : i32
    %c0_i32_0 = arith.constant 0 : i32
    return %arg0, %c0_i32 : i32, i32
  }
}

</mosaic_0001>

<bundles_post_ra>
// kernel: disen_dominant_forward.6
= control target key start
LH: loop header
LB: loop body
LE: loop exit
PB: predicated region body
PF: predicated region fallthrough
CT: control target
= control target key end

     0   :  { %s819_s1 = inlined_call_operand.vmem [shape: bf16[128,128], index: 1, kind: input, shape index: {}]   ;;  %s820_s0 = inlined_call_operand.vmem [shape: bf16[128,128], index: 0, kind: input, shape index: {}]   ;;  %s821_s2 = inlined_call_operand.vmem [shape: bf16[128,128], index: 2, kind: input, shape index: {}]   ;;  %s822_s3 = inlined_call_operand.vmem [shape: f32[1,128], index: 3, kind: input, shape index: {}]   ;;  %s823_s4 = inlined_call_operand.vmem [shape: f32[128,128], index: 4, kind: output, shape index: {}]  }
   0x1   :  { %v647_v0 = vld [vmem:[%s819_s1] sm:$0xff]   ;;  %v648_v1 = vld [vmem:[%s819_s1 + $0x8] sm:$0xff]   ;;  %v649_v2 = vld [vmem:[%s819_s1 + $0x10] sm:$0xff]  }
   0x2   :  { %583 = vmatprep.subr.bf16.mxu0 %v647_v0  ;;  %v650_v3 = vld [vmem:[%s819_s1 + $0x18] sm:$0xff]   ;;  %v655_v4 = vld [vmem:[%s820_s0] sm:$0xff]   ;;  %v652_v6 = vld [vmem:[%s819_s1 + $0x28] sm:$0xff]  }
   0x3   :  { %584 = vmatpush3.bf16.msra.mxu0 %v647_v0  ;;  %599 = vmatprep.mubr.bf16.mxu0 %v655_v4  ;;  %v651_v5 = vld [vmem:[%s819_s1 + $0x20] sm:$0xff]   ;;  %v664_v8 = vld [vmem:[%s821_s2 + $0x8] sm:$0xff]   ;;  %v653_v9 = vld [vmem:[%s819_s1 + $0x30] sm:$0xff]  }
   0x4   :  { %585 = vmatprep.subr.bf16.mxu0 %v648_v1  ;;  %v663_v7 = vld [vmem:[%s821_s2] sm:$0xff]   ;;  %v665_v10 = vld [vmem:[%s821_s2 + $0x10] sm:$0xff]   ;;  %v654_v11 = vld [vmem:[%s819_s1 + $0x38] sm:$0xff]  }
   0x5   :  { %615 = vmatprep.subr.bf16.mxu1 %v663_v7  ;;  %v666_v12 = vld [vmem:[%s821_s2 + $0x18] sm:$0xff]   ;;  %v667_v13 = vld [vmem:[%s821_s2 + $0x20] sm:$0xff]   ;;  %v656_v14 = vld [vmem:[%s820_s0 + $0x8] sm:$0xff]  }
   0x6   :  { %616 = vmatpush3.bf16.msra.mxu1 %v663_v7  ;;  %v657_v15 = vld [vmem:[%s820_s0 + $0x10] sm:$0xff]   ;;  %v668_v16 = vld [vmem:[%s821_s2 + $0x28] sm:$0xff]   ;;  %v658_v18 = vld [vmem:[%s820_s0 + $0x18] sm:$0xff]  }
   0x7   :  { %586 = vmatpush3.bf16.msra.mxu0 %v648_v1  ;;  %617 = vmatprep.subr.bf16.mxu1 %v664_v8  ;;  %v669_v17 = vld [vmem:[%s821_s2 + $0x30] sm:$0xff]   ;;  %v659_v19 = vld [vmem:[%s820_s0 + $0x20] sm:$0xff]   ;;  %v660_v20 = vld [vmem:[%s820_s0 + $0x28] sm:$0xff]  }
   0x8   :  { %587 = vmatprep.subr.bf16.mxu0 %v649_v2  ;;  %v661_v21 = vld [vmem:[%s820_s0 + $0x30] sm:$0xff]   ;;  %v662_v22 = vld [vmem:[%s820_s0 + $0x38] sm:$0xff]   ;;  %v542_v48 = vld [vmem:[%s822_s3] ss:$0 sm:$0xff] }
   0x9   :  { %v670_v23 = vld [vmem:[%s821_s2 + $0x38] sm:$0xff]  }
   0xa   :  { %618 = vmatpush3.bf16.msra.mxu1 %v664_v8 }
   0xb   :  { %588 = vmatpush3.bf16.msra.mxu0 %v649_v2  ;;  %619 = vmatprep.subr.bf16.mxu1 %v665_v10 }
   0xc   :  { %589 = vmatprep.subr.bf16.mxu0 %v650_v3 }
   0xe   :  { %620 = vmatpush3.bf16.msra.mxu1 %v665_v10 }
   0xf   :  { %590 = vmatpush3.bf16.msra.mxu0 %v650_v3  ;;  %621 = vmatprep.subr.bf16.mxu1 %v666_v12 }
  0x10   :  { %591 = vmatprep.subr.bf16.mxu0 %v651_v5 }
  0x12   :  { %622 = vmatpush3.bf16.msra.mxu1 %v666_v12 }
  0x13   :  { %592 = vmatpush3.bf16.msra.mxu0 %v651_v5  ;;  %623 = vmatprep.subr.bf16.mxu1 %v667_v13 }
  0x14   :  { %593 = vmatprep.subr.bf16.mxu0 %v652_v6 }
  0x16   :  { %624 = vmatpush3.bf16.msra.mxu1 %v667_v13 }
  0x17   :  { %594 = vmatpush3.bf16.msra.mxu0 %v652_v6  ;;  %625 = vmatprep.subr.bf16.mxu1 %v668_v16 }
  0x18   :  { %595 = vmatprep.subr.bf16.mxu0 %v653_v9 }
  0x1a   :  { %626 = vmatpush3.bf16.msra.mxu1 %v668_v16 }
  0x1b   :  { %596 = vmatpush3.bf16.msra.mxu0 %v653_v9  ;;  %627 = vmatprep.subr.bf16.mxu1 %v669_v17 }
  0x1c   :  { %597 = vmatprep.subr.bf16.mxu0 %v654_v11 }
  0x1e   :  { %628 = vmatpush3.bf16.msra.mxu1 %v669_v17 }
  0x1f   :  { %598 = vmatpush3.bf16.msra.mxu0 %v654_v11  ;;  %629 = vmatprep.subr.bf16.mxu1 %v670_v23 }
  0x22   :  { %600 = vmatmul.mubr.bf16.vlgmr.msra.gmra.mrb[0].mxu0 %v656_v14  ;;  %630 = vmatpush3.bf16.msra.mxu1 %v670_v23 }
  0x23   :  { %603 = vmatprep.mubr.bf16.mxu0 %v657_v15 }
  0x2a   :  { %604 = vmatmul.mubr.bf16.gmra.mrb[4].mxu0 %v658_v18 }
  0x2b   :  { %607 = vmatprep.mubr.bf16.mxu0 %v659_v19 }
  0x32   :  { %608 = vmatmul.mubr.bf16.gmra.mrb[8].mxu0 %v660_v20 }
  0x33   :  { %611 = vmatprep.mubr.bf16.mxu0 %v661_v21 }
  0x3a   :  { %612 = vmatmul.mubr.bf16.gmra.mrb[12].mxu0 %v662_v22 }
  0xf5   :  { %v601_v24 = vpop.f32.mrb[0].mxu0 }
  0xf6   :  { %v216_v25 = vpop.f32.mrb[1].mxu0 }
  0xf7   :  { %v602_v26 = vpop.f32.mrb[2].mxu0 }
  0xf8   :  { %v331_v27 = vpack.c.bf16 %v602_v26, %v601_v24  ;;  %v219_v28 = vpop.f32.mrb[3].mxu0 }
  0xf9   :  { %v330_v29 = vpack.c.bf16 %v219_v28, %v216_v25 }
  0xfb   :  { %631 = vmatprep.mubr.bf16.mxu1 %v330_v29 }
  0xfc   :  { %632 = vmatmul.mubr.bf16.vlgmr.msra.gmra.mrb[0].mxu1 %v331_v27 }
  0xfd   :  { %v605_v30 = vpop.f32.mrb[4].mxu0 }
  0xfe   :  { %v232_v31 = vpop.f32.mrb[5].mxu0 }
  0xff   :  { %v606_v32 = vpop.f32.mrb[6].mxu0 }
 0x100   :  { %v333_v33 = vpack.c.bf16 %v606_v32, %v605_v30  ;;  %v235_v34 = vpop.f32.mrb[7].mxu0 }
 0x101   :  { %v332_v35 = vpack.c.bf16 %v235_v34, %v232_v31 }
 0x103   :  { %635 = vmatprep.mubr.bf16.mxu1 %v332_v35 }
 0x104   :  { %636 = vmatmul.mubr.bf16.gmra.mrb[4].mxu1 %v333_v33 }
 0x105   :  { %v609_v36 = vpop.f32.mrb[8].mxu0 }
 0x106   :  { %v248_v37 = vpop.f32.mrb[9].mxu0 }
 0x107   :  { %v610_v38 = vpop.f32.mrb[10].mxu0 }
 0x108   :  { %v335_v39 = vpack.c.bf16 %v610_v38, %v609_v36  ;;  %v251_v40 = vpop.f32.mrb[11].mxu0 }
 0x109   :  { %v334_v41 = vpack.c.bf16 %v251_v40, %v248_v37 }
 0x10b   :  { %639 = vmatprep.mubr.bf16.mxu1 %v334_v41 }
 0x10c   :  { %640 = vmatmul.mubr.bf16.gmra.mrb[8].mxu1 %v335_v39 }
 0x10d   :  { %v613_v42 = vpop.f32.mrb[12].mxu0 }
 0x10e   :  { %v264_v43 = vpop.f32.mrb[13].mxu0 }
 0x10f   :  { %v614_v44 = vpop.f32.mrb[14].mxu0 }
 0x110   :  { %v337_v45 = vpack.c.bf16 %v614_v44, %v613_v42  ;;  %v267_v46 = vpop.f32.mrb[15].mxu0 }
 0x111   :  { %v336_v47 = vpack.c.bf16 %v267_v46, %v264_v43 }
 0x113   :  { %643 = vmatprep.mubr.bf16.mxu1 %v336_v47 }
 0x114   :  { %644 = vmatmul.mubr.bf16.gmra.mrb[12].mxu1 %v337_v45 }
 0x1cf   :  { %v633_v49 = vpop.f32.mrb[0].mxu1 }
 0x1d0   :  { %v452_v50 = vadd.f32 %v633_v49, %v542_v48  ;;  %v443_v51 = vpop.f32.mrb[1].mxu1 }
 0x1d1   :  { %v444_v52 = vadd.f32 %v542_v48, %v443_v51  ;;  %v634_v53 = vpop.f32.mrb[2].mxu1 }
 0x1d2   :  { %508 = vst [vmem:[%s823_s4 + $0x10] sm:$0xff] %v452_v50  ;;  %v455_v54 = vadd.f32 %v634_v53, %v542_v48  ;;  %v446_v55 = vpop.f32.mrb[3].mxu1 }
 0x1d3   :  { %506 = vst [vmem:[%s823_s4] sm:$0xff] %v444_v52  ;;  %v447_v56 = vadd.f32 %v542_v48, %v446_v55 }
 0x1d4   :  { %509 = vst [vmem:[%s823_s4 + $0x18] sm:$0xff] %v455_v54 }
 0x1d5   :  { %507 = vst [vmem:[%s823_s4 + $0x8] sm:$0xff] %v447_v56 }
 0x1d7   :  { %v637_v57 = vpop.f32.mrb[4].mxu1 }
 0x1d8   :  { %v468_v58 = vadd.f32 %v637_v57, %v542_v48  ;;  %v459_v59 = vpop.f32.mrb[5].mxu1 }
 0x1d9   :  { %v460_v60 = vadd.f32 %v542_v48, %v459_v59  ;;  %v638_v61 = vpop.f32.mrb[6].mxu1 }
 0x1da   :  { %512 = vst [vmem:[%s823_s4 + $0x30] sm:$0xff] %v468_v58  ;;  %v471_v62 = vadd.f32 %v638_v61, %v542_v48  ;;  %v462_v63 = vpop.f32.mrb[7].mxu1 }
 0x1db   :  { %510 = vst [vmem:[%s823_s4 + $0x20] sm:$0xff] %v460_v60  ;;  %v463_v0 = vadd.f32 %v542_v48, %v462_v63 }
 0x1dc   :  { %513 = vst [vmem:[%s823_s4 + $0x38] sm:$0xff] %v471_v62 }
 0x1dd   :  { %511 = vst [vmem:[%s823_s4 + $0x28] sm:$0xff] %v463_v0 }
 0x1df   :  { %v641_v1 = vpop.f32.mrb[8].mxu1 }
 0x1e0   :  { %v484_v2 = vadd.f32 %v641_v1, %v542_v48  ;;  %v475_v3 = vpop.f32.mrb[9].mxu1 }
 0x1e1   :  { %v476_v4 = vadd.f32 %v542_v48, %v475_v3  ;;  %v642_v5 = vpop.f32.mrb[10].mxu1 }
 0x1e2   :  { %516 = vst [vmem:[%s823_s4 + $0x50] sm:$0xff] %v484_v2  ;;  %v487_v6 = vadd.f32 %v642_v5, %v542_v48  ;;  %v478_v7 = vpop.f32.mrb[11].mxu1 }
 0x1e3   :  { %514 = vst [vmem:[%s823_s4 + $0x40] sm:$0xff] %v476_v4  ;;  %v479_v8 = vadd.f32 %v542_v48, %v478_v7 }
 0x1e4   :  { %517 = vst [vmem:[%s823_s4 + $0x58] sm:$0xff] %v487_v6 }
 0x1e5   :  { %515 = vst [vmem:[%s823_s4 + $0x48] sm:$0xff] %v479_v8 }
 0x1e7   :  { %v645_v9 = vpop.f32.mrb[12].mxu1 }
 0x1e8   :  { %v500_v10 = vadd.f32 %v645_v9, %v542_v48  ;;  %v491_v11 = vpop.f32.mrb[13].mxu1 }
 0x1e9   :  { %v492_v12 = vadd.f32 %v542_v48, %v491_v11  ;;  %v646_v13 = vpop.f32.mrb[14].mxu1 }
 0x1ea   :  { %520 = vst [vmem:[%s823_s4 + $0x70] sm:$0xff] %v500_v10  ;;  %v503_v14 = vadd.f32 %v646_v13, %v542_v48  ;;  %v494_v15 = vpop.f32.mrb[15].mxu1 }
 0x1eb   :  { %518 = vst [vmem:[%s823_s4 + $0x60] sm:$0xff] %v492_v12  ;;  %v495_v16 = vadd.f32 %v542_v48, %v494_v15 }
 0x1ec   :  { %521 = vst [vmem:[%s823_s4 + $0x78] sm:$0xff] %v503_v14 }
 0x1ed   :  { %519 = vst [vmem:[%s823_s4 + $0x68] sm:$0xff] %v495_v16 }

// kernel: disen_dominant_forward.7
= control target key start
LH: loop header
LB: loop body
LE: loop exit
PB: predicated region body
PF: predicated region fallthrough
CT: control target
= control target key end

     0   :  { %s640_s1 = inlined_call_operand.vmem [shape: bf16[128,128], index: 1, kind: input, shape index: {}, may-alias: {0,1}]   ;;  %s641_s0 = inlined_call_operand.vmem [shape: bf16[128,128], index: 0, kind: input, shape index: {}, may-alias: {0,1}]   ;;  %s642_s2 = inlined_call_operand.vmem [shape: f32[128,128], index: 2, kind: output, shape index: {}]  }
   0x1   :  { %v449_v0 = vld [vmem:[%s640_s1] sm:$0xff]   ;;  %v450_v1 = vld [vmem:[%s640_s1 + $0x8] sm:$0xff]   ;;  %v451_v2 = vld [vmem:[%s640_s1 + $0x10] sm:$0xff]  }
   0x2   :  { %401 = vmatprep.subr.bf16.mxu0 %v449_v0  ;;  %433 = vmatprep.subr.bf16.mxu1 %v449_v0  ;;  %v457_v3 = vld [vmem:[%s641_s0] sm:$0xff]   ;;  %v452_v5 = vld [vmem:[%s640_s1 + $0x18] sm:$0xff]   ;;  %v454_v7 = vld [vmem:[%s640_s1 + $0x28] sm:$0xff]  }
   0x3   :  { %402 = vmatpush3.bf16.xpose.msra.mxu0 %v449_v0  ;;  %441 = vmatpush3.bf16.xpose.msra.mxu1 %v449_v0  ;;  %v458_v4 = vld [vmem:[%s641_s0 + $0x20] sm:$0xff]   ;;  %v455_v8 = vld [vmem:[%s640_s1 + $0x30] sm:$0xff]   ;;  %v456_v9 = vld [vmem:[%s640_s1 + $0x38] sm:$0xff]  }
   0x4   :  { %403 = vmatprep.subr.bf16.mxu0 %v450_v1  ;;  %434 = vmatprep.subr.bf16.mxu1 %v450_v1  ;;  %v453_v6 = vld [vmem:[%s640_s1 + $0x20] sm:$0xff]   ;;  %v459_v10 = vld [vmem:[%s641_s0 + $0x8] sm:$0xff]   ;;  %v461_v12 = vld [vmem:[%s641_s0 + $0x10] sm:$0xff]  }
   0x5   :  { %417 = vmatprep.mubr.bf16.mxu0 %v457_v3  ;;  %425 = vmatprep.mubr.bf16.mxu1 %v458_v4  ;;  %v460_v11 = vld [vmem:[%s641_s0 + $0x28] sm:$0xff]   ;;  %v462_v13 = vld [vmem:[%s641_s0 + $0x30] sm:$0xff]   ;;  %v463_v14 = vld [vmem:[%s641_s0 + $0x18] sm:$0xff]  }
   0x6   :  { %v464_v15 = vld [vmem:[%s641_s0 + $0x38] sm:$0xff]  }
   0xb   :  { %404 = vmatpush3.bf16.xpose.msra.mxu0 %v450_v1  ;;  %442 = vmatpush3.bf16.xpose.msra.mxu1 %v450_v1 }
   0xc   :  { %405 = vmatprep.subr.bf16.mxu0 %v451_v2  ;;  %435 = vmatprep.subr.bf16.mxu1 %v451_v2 }
  0x13   :  { %406 = vmatpush3.bf16.xpose.msra.mxu0 %v451_v2  ;;  %443 = vmatpush3.bf16.xpose.msra.mxu1 %v451_v2 }
  0x14   :  { %407 = vmatprep.subr.bf16.mxu0 %v452_v5  ;;  %436 = vmatprep.subr.bf16.mxu1 %v452_v5 }
  0x1b   :  { %408 = vmatpush3.bf16.xpose.msra.mxu0 %v452_v5  ;;  %444 = vmatpush3.bf16.xpose.msra.mxu1 %v452_v5 }
  0x1c   :  { %409 = vmatprep.subr.bf16.mxu0 %v453_v6  ;;  %437 = vmatprep.subr.bf16.mxu1 %v453_v6 }
  0x23   :  { %410 = vmatpush3.bf16.xpose.msra.mxu0 %v453_v6  ;;  %445 = vmatpush3.bf16.xpose.msra.mxu1 %v453_v6 }
  0x24   :  { %411 = vmatprep.subr.bf16.mxu0 %v454_v7  ;;  %438 = vmatprep.subr.bf16.mxu1 %v454_v7 }
  0x2b   :  { %412 = vmatpush3.bf16.xpose.msra.mxu0 %v454_v7  ;;  %446 = vmatpush3.bf16.xpose.msra.mxu1 %v454_v7 }
  0x2c   :  { %413 = vmatprep.subr.bf16.mxu0 %v455_v8  ;;  %439 = vmatprep.subr.bf16.mxu1 %v455_v8 }
  0x33   :  { %414 = vmatpush3.bf16.xpose.msra.mxu0 %v455_v8  ;;  %447 = vmatpush3.bf16.xpose.msra.mxu1 %v455_v8 }
  0x34   :  { %415 = vmatprep.subr.bf16.mxu0 %v456_v9  ;;  %440 = vmatprep.subr.bf16.mxu1 %v456_v9 }
  0x3b   :  { %416 = vmatpush3.bf16.xpose.msra.mxu0 %v456_v9  ;;  %448 = vmatpush3.bf16.xpose.msra.mxu1 %v456_v9 }
  0x42   :  { %418 = vmatmul.mubr.bf16.vlgmr.msra.gmra.mrb[0].mxu0 %v459_v10  ;;  %426 = vmatmul.mubr.bf16.vlgmr.msra.gmra.mrb[0].mxu1 %v460_v11 }
  0x43   :  { %421 = vmatprep.mubr.bf16.mxu0 %v461_v12  ;;  %429 = vmatprep.mubr.bf16.mxu1 %v462_v13 }
  0x4a   :  { %422 = vmatmul.mubr.bf16.gmra.mrb[4].mxu0 %v463_v14  ;;  %430 = vmatmul.mubr.bf16.gmra.mrb[4].mxu1 %v464_v15 }
 0x115   :  { %v419_v16 = vpop.f32.mrb[0].mxu0  ;;  %v427_v17 = vpop.f32.mrb[0].mxu1 }
 0x116   :  { %v371_v18 = vmul.f32 -1.442695, %v419_v16  ;;  %v379_v19 = vmul.f32 -1.442695, %v427_v17  ;;  %v174_v20 = vpop.f32.mrb[1].mxu0  ;;  %v206_v21 = vpop.f32.mrb[1].mxu1 }
 0x117   :  { %v369_v22 = vmul.f32 -1.442695, %v174_v20  ;;  %v377_v23 = vmul.f32 -1.442695, %v206_v21  ;;  %v420_v24 = vpop.f32.mrb[2].mxu0  ;;  %v428_v25 = vpop.f32.mrb[2].mxu1 }
 0x118   :  { %465 = vpow2.f32 %v371_v18  ;;  %v372_v26 = vmul.f32 -1.442695, %v420_v24  ;;  %v177_v27 = vpop.f32.mrb[3].mxu0  ;;  %v209_v28 = vpop.f32.mrb[3].mxu1  ;;  %v380_v29 = vmul.f32 -1.442695, %v428_v25 }
 0x119   :  { %467 = vpow2.f32 %v379_v19  ;;  %v370_v30 = vmul.f32 -1.442695, %v177_v27  ;;  %v378_v31 = vmul.f32 -1.442695, %v209_v28 }
 0x11a   :  { %469 = vpow2.f32 %v369_v22 }
 0x11b   :  { %471 = vpow2.f32 %v377_v23 }
 0x11c   :  { %473 = vpow2.f32 %v372_v26 }
 0x11d   :  { %475 = vpow2.f32 %v380_v29  ;;  %v423_v32 = vpop.f32.mrb[4].mxu0  ;;  %v431_v33 = vpop.f32.mrb[4].mxu1 }
 0x11e   :  { %477 = vpow2.f32 %v370_v30  ;;  %v375_v34 = vmul.f32 -1.442695, %v423_v32  ;;  %v383_v35 = vmul.f32 -1.442695, %v431_v33  ;;  %v190_v36 = vpop.f32.mrb[5].mxu0  ;;  %v222_v37 = vpop.f32.mrb[5].mxu1 }
 0x11f   :  { %479 = vpow2.f32 %v378_v31  ;;  %v373_v38 = vmul.f32 -1.442695, %v190_v36  ;;  %v381_v39 = vmul.f32 -1.442695, %v222_v37  ;;  %v424_v40 = vpop.f32.mrb[6].mxu0  ;;  %v432_v41 = vpop.f32.mrb[6].mxu1 }
 0x120   :  { %481 = vpow2.f32 %v375_v34  ;;  %v376_v42 = vmul.f32 -1.442695, %v424_v40  ;;  %v193_v43 = vpop.f32.mrb[7].mxu0  ;;  %v225_v44 = vpop.f32.mrb[7].mxu1  ;;  %v384_v6 = vmul.f32 -1.442695, %v432_v41 }
 0x121   :  { %483 = vpow2.f32 %v383_v35  ;;  %v374_v9 = vmul.f32 -1.442695, %v193_v43  ;;  %v382_v11 = vmul.f32 -1.442695, %v225_v44 }
 0x122   :  { %v466_v45 = vpop.eup %465  ;;  %485 = vpow2.f32 %v373_v38 }
 0x123   :  { %v468_v46 = vpop.eup %467  ;;  %v287_v47 = vadd.f32 1.0, %v466_v45  ;;  %487 = vpow2.f32 %v381_v39 }
 0x124   :  { %v470_v48 = vpop.eup %469  ;;  %v295_v49 = vadd.f32 1.0, %v468_v46  ;;  %489 = vpow2.f32 %v376_v42 }
 0x125   :  { %v472_v50 = vpop.eup %471  ;;  %491 = vrcp.f32 %v287_v47  ;;  %v285_v51 = vadd.f32 1.0, %v470_v48 }
 0x126   :  { %v474_v52 = vpop.eup %473  ;;  %493 = vrcp.f32 %v295_v49  ;;  %v293_v53 = vadd.f32 1.0, %v472_v50 }
 0x127   :  { %v476_v54 = vpop.eup %475  ;;  %495 = vrcp.f32 %v285_v51  ;;  %v288_v55 = vadd.f32 1.0, %v474_v52 }
 0x128   :  { %v478_v56 = vpop.eup %477  ;;  %497 = vrcp.f32 %v293_v53  ;;  %v296_v57 = vadd.f32 1.0, %v476_v54 }
 0x129   :  { %v480_v58 = vpop.eup %479  ;;  %499 = vrcp.f32 %v288_v55  ;;  %v286_v59 = vadd.f32 1.0, %v478_v56 }
 0x12a   :  { %v482_v60 = vpop.eup %481  ;;  %501 = vrcp.f32 %v296_v57  ;;  %v294_v61 = vadd.f32 1.0, %v480_v58 }
 0x12b   :  { %v484_v62 = vpop.eup %483  ;;  %503 = vrcp.f32 %v286_v59  ;;  %v291_v63 = vadd.f32 1.0, %v482_v60 }
 0x12c   :  { %v486_v0 = vpop.eup %485  ;;  %505 = vrcp.f32 %v294_v61  ;;  %v299_v1 = vadd.f32 1.0, %v484_v62 }
 0x12d   :  { %v488_v2 = vpop.eup %487  ;;  %507 = vrcp.f32 %v291_v63  ;;  %v289_v3 = vadd.f32 1.0, %v486_v0 }
 0x12e   :  { %v490_v4 = vpop.eup %489  ;;  %509 = vrcp.f32 %v299_v1  ;;  %v297_v5 = vadd.f32 1.0, %v488_v2 }
 0x12f   :  { %v492_v7 = vpop.eup %491  ;;  %511 = vrcp.f32 %v289_v3  ;;  %v292_v8 = vadd.f32 1.0, %v490_v4 }
 0x130   :  { %v494_v10 = vpop.eup %493  ;;  %335 = vst [vmem:[%s642_s2 + $0x10] sm:$0xff] %v492_v7  ;;  %513 = vrcp.f32 %v297_v5 }
 0x131   :  { %v496_v12 = vpop.eup %495  ;;  %343 = vst [vmem:[%s642_s2 + $0x50] sm:$0xff] %v494_v10  ;;  %515 = vrcp.f32 %v292_v8 }
 0x132   :  { %v498_v13 = vpop.eup %497  ;;  %333 = vst [vmem:[%s642_s2] sm:$0xff] %v496_v12  ;;  %517 = vpow2.f32 %v384_v6 }
 0x133   :  { %v500_v14 = vpop.eup %499  ;;  %341 = vst [vmem:[%s642_s2 + $0x40] sm:$0xff] %v498_v13  ;;  %519 = vpow2.f32 %v374_v9 }
 0x134   :  { %v502_v15 = vpop.eup %501  ;;  %336 = vst [vmem:[%s642_s2 + $0x18] sm:$0xff] %v500_v14  ;;  %521 = vpow2.f32 %v382_v11 }
 0x135   :  { %v504_v16 = vpop.eup %503  ;;  %344 = vst [vmem:[%s642_s2 + $0x58] sm:$0xff] %v502_v15 }
 0x136   :  { %v506_v17 = vpop.eup %505  ;;  %334 = vst [vmem:[%s642_s2 + $0x8] sm:$0xff] %v504_v16 }
 0x137   :  { %v508_v18 = vpop.eup %507  ;;  %342 = vst [vmem:[%s642_s2 + $0x48] sm:$0xff] %v506_v17 }
 0x138   :  { %v510_v19 = vpop.eup %509  ;;  %339 = vst [vmem:[%s642_s2 + $0x30] sm:$0xff] %v508_v18 }
 0x139   :  { %v512_v20 = vpop.eup %511  ;;  %347 = vst [vmem:[%s642_s2 + $0x70] sm:$0xff] %v510_v19 }
 0x13a   :  { %v514_v21 = vpop.eup %513  ;;  %337 = vst [vmem:[%s642_s2 + $0x20] sm:$0xff] %v512_v20 }
 0x13b   :  { %v516_v22 = vpop.eup %515  ;;  %345 = vst [vmem:[%s642_s2 + $0x60] sm:$0xff] %v514_v21 }
 0x13c   :  { %v518_v23 = vpop.eup %517  ;;  %340 = vst [vmem:[%s642_s2 + $0x38] sm:$0xff] %v516_v22 }
 0x13d   :  { %v520_v24 = vpop.eup %519  ;;  %v300_v25 = vadd.f32 1.0, %v518_v23 }
 0x13e   :  { %v522_v26 = vpop.eup %521  ;;  %v290_v27 = vadd.f32 1.0, %v520_v24 }
 0x13f   :  { %523 = vrcp.f32 %v300_v25  ;;  %v298_v28 = vadd.f32 1.0, %v522_v26 }
 0x140   :  { %525 = vrcp.f32 %v290_v27 }
 0x141   :  { %527 = vrcp.f32 %v298_v28 }
 0x149   :  { %v524_v29 = vpop.eup %523 }
 0x14a   :  { %v526_v30 = vpop.eup %525  ;;  %348 = vst [vmem:[%s642_s2 + $0x78] sm:$0xff] %v524_v29 }
 0x14b   :  { %v528_v31 = vpop.eup %527  ;;  %338 = vst [vmem:[%s642_s2 + $0x28] sm:$0xff] %v526_v30 }
 0x14c   :  { %346 = vst [vmem:[%s642_s2 + $0x68] sm:$0xff] %v528_v31 }

// kernel: disen_dominant_forward.4
= control target key start
LH: loop header
LB: loop body
LE: loop exit
PB: predicated region body
PF: predicated region fallthrough
CT: control target
= control target key end

     0   :  { %s954_s1 = inlined_call_operand.vmem [shape: bf16[128,128], index: 1, kind: input, shape index: {}]   ;;  %s955_s0 = inlined_call_operand.vmem [shape: bf16[128,128], index: 0, kind: input, shape index: {}]   ;;  %s956_s2 = inlined_call_operand.vmem [shape: bf16[128,128], index: 2, kind: input, shape index: {}]   ;;  %s957_s3 = inlined_call_operand.vmem [shape: f32[1,128], index: 3, kind: input, shape index: {}]   ;;  %s958_s4 = inlined_call_operand.vmem [shape: bf16[128,128], index: 4, kind: output, shape index: {}]  }
   0x1   :  { %v806_v0 = vld [vmem:[%s954_s1] sm:$0xff]   ;;  %v807_v1 = vld [vmem:[%s954_s1 + $0x8] sm:$0xff]   ;;  %v808_v2 = vld [vmem:[%s954_s1 + $0x10] sm:$0xff]  }
   0x2   :  { %742 = vmatprep.subr.bf16.mxu0 %v806_v0  ;;  %v809_v3 = vld [vmem:[%s954_s1 + $0x18] sm:$0xff]   ;;  %v814_v4 = vld [vmem:[%s955_s0] sm:$0xff]   ;;  %v811_v6 = vld [vmem:[%s954_s1 + $0x28] sm:$0xff]  }
   0x3   :  { %743 = vmatpush3.bf16.msra.mxu0 %v806_v0  ;;  %758 = vmatprep.mubr.bf16.mxu0 %v814_v4  ;;  %v810_v5 = vld [vmem:[%s954_s1 + $0x20] sm:$0xff]   ;;  %v823_v8 = vld [vmem:[%s956_s2 + $0x8] sm:$0xff]   ;;  %v812_v9 = vld [vmem:[%s954_s1 + $0x30] sm:$0xff]  }
   0x4   :  { %744 = vmatprep.subr.bf16.mxu0 %v807_v1  ;;  %v822_v7 = vld [vmem:[%s956_s2] sm:$0xff]   ;;  %v824_v10 = vld [vmem:[%s956_s2 + $0x10] sm:$0xff]   ;;  %v813_v11 = vld [vmem:[%s954_s1 + $0x38] sm:$0xff]  }
   0x5   :  { %774 = vmatprep.subr.bf16.mxu1 %v822_v7  ;;  %v825_v12 = vld [vmem:[%s956_s2 + $0x18] sm:$0xff]   ;;  %v826_v13 = vld [vmem:[%s956_s2 + $0x20] sm:$0xff]   ;;  %v815_v14 = vld [vmem:[%s955_s0 + $0x8] sm:$0xff]  }
   0x6   :  { %775 = vmatpush3.bf16.msra.mxu1 %v822_v7  ;;  %v816_v15 = vld [vmem:[%s955_s0 + $0x10] sm:$0xff]   ;;  %v827_v16 = vld [vmem:[%s956_s2 + $0x28] sm:$0xff]   ;;  %v817_v18 = vld [vmem:[%s955_s0 + $0x18] sm:$0xff]  }
   0x7   :  { %745 = vmatpush3.bf16.msra.mxu0 %v807_v1  ;;  %776 = vmatprep.subr.bf16.mxu1 %v823_v8  ;;  %v828_v17 = vld [vmem:[%s956_s2 + $0x30] sm:$0xff]   ;;  %v818_v19 = vld [vmem:[%s955_s0 + $0x20] sm:$0xff]   ;;  %v819_v20 = vld [vmem:[%s955_s0 + $0x28] sm:$0xff]  }
   0x8   :  { %746 = vmatprep.subr.bf16.mxu0 %v808_v2  ;;  %v820_v21 = vld [vmem:[%s955_s0 + $0x30] sm:$0xff]   ;;  %v821_v22 = vld [vmem:[%s955_s0 + $0x38] sm:$0xff]   ;;  %v622_v48 = vld [vmem:[%s957_s3] ss:$0 sm:$0xff] }
   0x9   :  { %v829_v23 = vld [vmem:[%s956_s2 + $0x38] sm:$0xff]  }
   0xa   :  { %777 = vmatpush3.bf16.msra.mxu1 %v823_v8 }
   0xb   :  { %747 = vmatpush3.bf16.msra.mxu0 %v808_v2  ;;  %778 = vmatprep.subr.bf16.mxu1 %v824_v10 }
   0xc   :  { %748 = vmatprep.subr.bf16.mxu0 %v809_v3 }
   0xe   :  { %779 = vmatpush3.bf16.msra.mxu1 %v824_v10 }
   0xf   :  { %749 = vmatpush3.bf16.msra.mxu0 %v809_v3  ;;  %780 = vmatprep.subr.bf16.mxu1 %v825_v12 }
  0x10   :  { %750 = vmatprep.subr.bf16.mxu0 %v810_v5 }
  0x12   :  { %781 = vmatpush3.bf16.msra.mxu1 %v825_v12 }
  0x13   :  { %751 = vmatpush3.bf16.msra.mxu0 %v810_v5  ;;  %782 = vmatprep.subr.bf16.mxu1 %v826_v13 }
  0x14   :  { %752 = vmatprep.subr.bf16.mxu0 %v811_v6 }
  0x16   :  { %783 = vmatpush3.bf16.msra.mxu1 %v826_v13 }
  0x17   :  { %753 = vmatpush3.bf16.msra.mxu0 %v811_v6  ;;  %784 = vmatprep.subr.bf16.mxu1 %v827_v16 }
  0x18   :  { %754 = vmatprep.subr.bf16.mxu0 %v812_v9 }
  0x1a   :  { %785 = vmatpush3.bf16.msra.mxu1 %v827_v16 }
  0x1b   :  { %755 = vmatpush3.bf16.msra.mxu0 %v812_v9  ;;  %786 = vmatprep.subr.bf16.mxu1 %v828_v17 }
  0x1c   :  { %756 = vmatprep.subr.bf16.mxu0 %v813_v11 }
  0x1e   :  { %787 = vmatpush3.bf16.msra.mxu1 %v828_v17 }
  0x1f   :  { %757 = vmatpush3.bf16.msra.mxu0 %v813_v11  ;;  %788 = vmatprep.subr.bf16.mxu1 %v829_v23 }
  0x22   :  { %759 = vmatmul.mubr.bf16.vlgmr.msra.gmra.mrb[0].mxu0 %v815_v14  ;;  %789 = vmatpush3.bf16.msra.mxu1 %v829_v23 }
  0x23   :  { %762 = vmatprep.mubr.bf16.mxu0 %v816_v15 }
  0x2a   :  { %763 = vmatmul.mubr.bf16.gmra.mrb[4].mxu0 %v817_v18 }
  0x2b   :  { %766 = vmatprep.mubr.bf16.mxu0 %v818_v19 }
  0x32   :  { %767 = vmatmul.mubr.bf16.gmra.mrb[8].mxu0 %v819_v20 }
  0x33   :  { %770 = vmatprep.mubr.bf16.mxu0 %v820_v21 }
  0x3a   :  { %771 = vmatmul.mubr.bf16.gmra.mrb[12].mxu0 %v821_v22 }
  0xf5   :  { %v760_v24 = vpop.f32.mrb[0].mxu0 }
  0xf6   :  { %v216_v25 = vpop.f32.mrb[1].mxu0 }
  0xf7   :  { %v761_v26 = vpop.f32.mrb[2].mxu0 }
  0xf8   :  { %v331_v27 = vpack.c.bf16 %v761_v26, %v760_v24  ;;  %v219_v28 = vpop.f32.mrb[3].mxu0 }
  0xf9   :  { %v330_v29 = vpack.c.bf16 %v219_v28, %v216_v25 }
  0xfb   :  { %790 = vmatprep.mubr.bf16.mxu1 %v330_v29 }
  0xfc   :  { %791 = vmatmul.mubr.bf16.vlgmr.msra.gmra.mrb[0].mxu1 %v331_v27 }
  0xfd   :  { %v764_v30 = vpop.f32.mrb[4].mxu0 }
  0xfe   :  { %v232_v31 = vpop.f32.mrb[5].mxu0 }
  0xff   :  { %v765_v32 = vpop.f32.mrb[6].mxu0 }
 0x100   :  { %v333_v33 = vpack.c.bf16 %v765_v32, %v764_v30  ;;  %v235_v34 = vpop.f32.mrb[7].mxu0 }
 0x101   :  { %v332_v35 = vpack.c.bf16 %v235_v34, %v232_v31 }
 0x103   :  { %794 = vmatprep.mubr.bf16.mxu1 %v332_v35 }
 0x104   :  { %795 = vmatmul.mubr.bf16.gmra.mrb[4].mxu1 %v333_v33 }
 0x105   :  { %v768_v36 = vpop.f32.mrb[8].mxu0 }
 0x106   :  { %v248_v37 = vpop.f32.mrb[9].mxu0 }
 0x107   :  { %v769_v38 = vpop.f32.mrb[10].mxu0 }
 0x108   :  { %v335_v39 = vpack.c.bf16 %v769_v38, %v768_v36  ;;  %v251_v40 = vpop.f32.mrb[11].mxu0 }
 0x109   :  { %v334_v41 = vpack.c.bf16 %v251_v40, %v248_v37 }
 0x10b   :  { %798 = vmatprep.mubr.bf16.mxu1 %v334_v41 }
 0x10c   :  { %799 = vmatmul.mubr.bf16.gmra.mrb[8].mxu1 %v335_v39 }
 0x10d   :  { %v772_v42 = vpop.f32.mrb[12].mxu0 }
 0x10e   :  { %v264_v43 = vpop.f32.mrb[13].mxu0 }
 0x10f   :  { %v773_v44 = vpop.f32.mrb[14].mxu0 }
 0x110   :  { %v337_v45 = vpack.c.bf16 %v773_v44, %v772_v42  ;;  %v267_v46 = vpop.f32.mrb[15].mxu0 }
 0x111   :  { %v336_v47 = vpack.c.bf16 %v267_v46, %v264_v43 }
 0x113   :  { %802 = vmatprep.mubr.bf16.mxu1 %v336_v47 }
 0x114   :  { %803 = vmatmul.mubr.bf16.gmra.mrb[12].mxu1 %v337_v45 }
 0x1cf   :  { %v792_v49 = vpop.f32.mrb[0].mxu1 }
 0x1d0   :  { %v452_v50 = vadd.f32 %v792_v49, %v622_v48  ;;  %v443_v51 = vpop.f32.mrb[1].mxu1 }
 0x1d1   :  { %v444_v52 = vadd.f32 %v622_v48, %v443_v51  ;;  %v793_v53 = vpop.f32.mrb[2].mxu1 }
 0x1d2   :  { %v455_v54 = vadd.f32 %v793_v53, %v622_v48  ;;  %v446_v55 = vpop.f32.mrb[3].mxu1  ;;  %v508_v57 = vmax.f32 %v452_v50, 0.0 }
 0x1d3   :  { %v447_v56 = vadd.f32 %v622_v48, %v446_v55  ;;  %v506_v59 = vmax.f32 %v444_v52, 0.0 }
 0x1d4   :  { %v509_v58 = vmax.f32 %v455_v54, 0.0 }
 0x1d5   :  { %v507_v60 = vmax.f32 %v447_v56, 0.0 }
 0x1d6   :  { %v671_v61 = vpack.c.bf16 %v509_v58, %v508_v57 }
 0x1d7   :  { %v666_v62 = vpack.c.bf16 %v507_v60, %v506_v59  ;;  %v796_v63 = vpop.f32.mrb[4].mxu1 }
 0x1d8   :  { %703 = vst [vmem:[%s958_s4 + $0x8] sm:$0xff] %v671_v61   ;;  %v468_v0 = vadd.f32 %v796_v63, %v622_v48  ;;  %v459_v1 = vpop.f32.mrb[5].mxu1 }
 0x1d9   :  { %667 = vst [vmem:[%s958_s4] sm:$0xff] %v666_v62   ;;  %v460_v2 = vadd.f32 %v622_v48, %v459_v1  ;;  %v797_v3 = vpop.f32.mrb[6].mxu1 }
 0x1da   :  { %v471_v4 = vadd.f32 %v797_v3, %v622_v48  ;;  %v462_v5 = vpop.f32.mrb[7].mxu1  ;;  %v512_v7 = vmax.f32 %v468_v0, 0.0 }
 0x1db   :  { %v463_v6 = vadd.f32 %v622_v48, %v462_v5  ;;  %v510_v9 = vmax.f32 %v460_v2, 0.0 }
 0x1dc   :  { %v513_v8 = vmax.f32 %v471_v4, 0.0 }
 0x1dd   :  { %v511_v10 = vmax.f32 %v463_v6, 0.0 }
 0x1de   :  { %v681_v11 = vpack.c.bf16 %v513_v8, %v512_v7 }
 0x1df   :  { %v676_v12 = vpack.c.bf16 %v511_v10, %v510_v9  ;;  %v800_v13 = vpop.f32.mrb[8].mxu1 }
 0x1e0   :  { %705 = vst [vmem:[%s958_s4 + $0x18] sm:$0xff] %v681_v11   ;;  %v484_v14 = vadd.f32 %v800_v13, %v622_v48  ;;  %v475_v15 = vpop.f32.mrb[9].mxu1 }
 0x1e1   :  { %704 = vst [vmem:[%s958_s4 + $0x10] sm:$0xff] %v676_v12   ;;  %v476_v16 = vadd.f32 %v622_v48, %v475_v15  ;;  %v801_v17 = vpop.f32.mrb[10].mxu1 }
 0x1e2   :  { %v487_v18 = vadd.f32 %v801_v17, %v622_v48  ;;  %v478_v19 = vpop.f32.mrb[11].mxu1  ;;  %v516_v21 = vmax.f32 %v484_v14, 0.0 }
 0x1e3   :  { %v479_v20 = vadd.f32 %v622_v48, %v478_v19  ;;  %v514_v23 = vmax.f32 %v476_v16, 0.0 }
 0x1e4   :  { %v517_v22 = vmax.f32 %v487_v18, 0.0 }
 0x1e5   :  { %v515_v24 = vmax.f32 %v479_v20, 0.0 }
 0x1e6   :  { %v691_v25 = vpack.c.bf16 %v517_v22, %v516_v21 }
 0x1e7   :  { %v686_v26 = vpack.c.bf16 %v515_v24, %v514_v23  ;;  %v804_v27 = vpop.f32.mrb[12].mxu1 }
 0x1e8   :  { %707 = vst [vmem:[%s958_s4 + $0x28] sm:$0xff] %v691_v25   ;;  %v500_v28 = vadd.f32 %v804_v27, %v622_v48  ;;  %v491_v29 = vpop.f32.mrb[13].mxu1 }
 0x1e9   :  { %706 = vst [vmem:[%s958_s4 + $0x20] sm:$0xff] %v686_v26   ;;  %v492_v30 = vadd.f32 %v622_v48, %v491_v29  ;;  %v805_v31 = vpop.f32.mrb[14].mxu1 }
 0x1ea   :  { %v503_v32 = vadd.f32 %v805_v31, %v622_v48  ;;  %v494_v33 = vpop.f32.mrb[15].mxu1  ;;  %v520_v35 = vmax.f32 %v500_v28, 0.0 }
 0x1eb   :  { %v495_v34 = vadd.f32 %v622_v48, %v494_v33  ;;  %v518_v37 = vmax.f32 %v492_v30, 0.0 }
 0x1ec   :  { %v521_v36 = vmax.f32 %v503_v32, 0.0 }
 0x1ed   :  { %v519_v38 = vmax.f32 %v495_v34, 0.0 }
 0x1ee   :  { %v701_v39 = vpack.c.bf16 %v521_v36, %v520_v35 }
 0x1ef   :  { %v696_v40 = vpack.c.bf16 %v519_v38, %v518_v37 }
 0x1f0   :  { %709 = vst [vmem:[%s958_s4 + $0x38] sm:$0xff] %v701_v39  }
 0x1f1   :  { %708 = vst [vmem:[%s958_s4 + $0x30] sm:$0xff] %v696_v40  }

</bundles_post_ra>
